<compile_context>
chip_gen: v7x
topology: tpu7x:2x2x1
jax: 0.10.0
libtpu: 0.0.40
codegen_flags: <defaults>
</compile_context>

<pallas_src>
import functools

import jax
import jax.numpy as jnp
from jax.experimental import pallas as pl
from jax.experimental.pallas import tpu as pltpu


_LANE = 128


def _round_up(n, m):
    return ((n + m - 1) // m) * m


def _param_layout(state_size, hidden_size, action_size):
    """Row offsets of each tensor in the packed (rows, 128) parameter buffer.

    Weights are stored in torch (out, in) layout; biases as single columns in
    lane 0.  Row offsets are multiples of 16 so slices stay tile-aligned for
    both f32 (8-row tiles) and bf16 (16-row packed tiles).
    """
    assert state_size <= _LANE and hidden_size <= _LANE and action_size <= _LANE, (
        "this kernel assumes state/hidden/action sizes <= 128 (no K tiling)")
    h16 = _round_up(hidden_size, 16)
    a16 = _round_up(action_size, 16)
    ow1 = 0
    ob1 = ow1 + h16
    ow2 = ob1 + h16
    ob2 = ow2 + h16
    ow3 = ob2 + h16
    ob3 = ow3 + a16
    rows = ob3 + a16
    return (ow1, ob1, ow2, ob2, ow3, ob3), rows, _LANE


def pack_actor_params(w1, b1, w2, b2, w3, b3, dtype=jnp.bfloat16):
    """Pack torch-layout (out, in) weights + biases into one lane-dense buffer."""
    H, S = w1.shape
    A = w3.shape[0]
    (ow1, ob1, ow2, ob2, ow3, ob3), rows, lane = _param_layout(S, H, A)
    p = jnp.zeros((rows, lane), jnp.float32)
    p = p.at[ow1:ow1 + H, :S].set(w1)
    p = p.at[ob1:ob1 + H, 0].set(b1.reshape(-1))
    p = p.at[ow2:ow2 + H, :H].set(w2)
    p = p.at[ob2:ob2 + H, 0].set(b2.reshape(-1))
    p = p.at[ow3:ow3 + A, :H].set(w3)
    p = p.at[ob3:ob3 + A, 0].set(b3.reshape(-1))
    return p.astype(dtype)


def _actor_kernel(x_ref, p_ref, o_ref, *, S, H, A, offs, act_dtype):
    """3-layer MLP on one batch tile, computed in (feature, batch) orientation.

    x_ref: (S, TB)  input tile, batch on the lane axis.
    p_ref: (rows, 128) packed parameters (resident across grid steps).
    o_ref: (A, TB)  logits tile, batch on the lane axis.
    """
    ow1, ob1, ow2, ob2, ow3, ob3 = offs
    f32 = jnp.float32
    cdt = p_ref.dtype          # MXU operand dtype (bf16 on TPU)
    adt = act_dtype            # bias-add / tanh dtype (bf16 on v6e/v7x, f32 on v5e)

    xt = x_ref[...].astype(cdt)                                    # (S, TB)

    # Layer 1: h1 = tanh(W1 @ x + b1)      -> (H, TB)
    w1 = p_ref[ow1:ow1 + H, 0:S]                                   # (H, S)
    b1 = p_ref[ob1:ob1 + H, 0:1].astype(f32)                       # (H, 1)
    h1 = jnp.tanh(
        (jnp.dot(w1, xt, preferred_element_type=f32) + b1).astype(adt))

    # Layer 2: h2 = tanh(W2 @ h1 + b2)     -> (H, TB)
    w2 = p_ref[ow2:ow2 + H, 0:H]                                   # (H, H)
    b2 = p_ref[ob2:ob2 + H, 0:1].astype(f32)
    h2 = jnp.tanh(
        (jnp.dot(w2, h1.astype(cdt), preferred_element_type=f32) + b2).astype(adt))

    # Layer 3 (logits): only sublane-aligned A rows are computed; rows >= A are 0.
    ar = _round_up(A, 8)
    w3 = p_ref[ow3:ow3 + ar, 0:H]                                  # (ar, H)
    b3 = p_ref[ob3:ob3 + ar, 0:1].astype(f32)
    out = jnp.dot(w3, h2.astype(cdt), preferred_element_type=f32) + b3  # (ar, TB)

    o_ref[...] = out[:A, :].astype(o_ref.dtype)


def default_dtypes():
    """(parameter storage dtype, activation dtype) for the current backend."""
    try:
        dev = jax.devices()[0]
    except Exception:
        return jnp.float32, jnp.float32
    if dev.platform != "tpu":
        return jnp.float32, jnp.float32
    kind = dev.device_kind.lower()
    old_vpu = any(v in kind for v in ("v2", "v3", "v4", "v5"))
    # bf16 weights everywhere (MXU-native); bf16 tanh/bias only where the
    # VPU/EUP are bf16-capable (v6e / v7x).
    return jnp.bfloat16, (jnp.float32 if old_vpu else jnp.bfloat16)


def _dim_semantics(n_steps):
    """CORE_PARALLEL on multi-TensorCore parts (v7x); plain 'parallel' elsewhere."""
    try:
        dev = jax.devices()[0]
        kind = dev.device_kind.lower() if dev.platform == "tpu" else ""
    except Exception:
        kind = ""
    if "v7" in kind and n_steps >= 2:
        return (pltpu.CORE_PARALLEL,)
    return ("parallel",)


@functools.partial(
    jax.jit,
    static_argnames=("state_size", "action_size", "hidden_size", "block_cols",
                     "act_dtype"))
def actor_forward(x, packed, *, state_size, action_size, hidden_size=64,
                  block_cols=None, act_dtype=None):
    # Flatten like x.view(x.size(0), -1).
    x2d = x.reshape(x.shape[0], -1)
    batch, s_in = x2d.shape
    assert s_in == state_size, "flattened feature dim must equal state_size"
    offs, rows, lane = _param_layout(state_size, hidden_size, action_size)
    assert packed.shape == (rows, lane), "packed params have unexpected layout"
    if act_dtype is None:
        act_dtype = default_dtypes()[1]

    # Batch lives on the lane axis -> tile must be a multiple of 128 lanes.
    if block_cols is None:
        tb = min(2048, _round_up(batch, _LANE))
        tb = _round_up(pl.cdiv(batch, pl.cdiv(batch, tb)), _LANE)  # minimize padding
    else:
        tb = _round_up(block_cols, _LANE)
    n_steps = pl.cdiv(batch, tb)
    batch_pad = n_steps * tb

    xt = x2d.T                                                     # (S, batch)
    if batch_pad != batch:
        xt = jnp.pad(xt, ((0, 0), (0, batch_pad - batch)))

    kernel = functools.partial(_actor_kernel, S=state_size, H=hidden_size,
                               A=action_size, offs=offs, act_dtype=act_dtype)

    out_t = pl.pallas_call(
        kernel,
        out_shape=jax.ShapeDtypeStruct((action_size, batch_pad), jnp.float32),
        grid=(n_steps,),
        in_specs=[
            pl.BlockSpec((state_size, tb), lambda i: (0, i)),
            pl.BlockSpec((rows, lane), lambda i: (0, 0)),   # params stay resident
        ],
        out_specs=pl.BlockSpec((action_size, tb), lambda i: (0, i)),
        compiler_params=pltpu.CompilerParams(
            dimension_semantics=_dim_semantics(n_steps)),
    )(xt, packed)

    # TODO(synk): for rollout-sized batches, fuse the downstream softmax/argmax/
    # sampling into the kernel and keep `packed` resident across calls (P10) so
    # the per-call latency is launch-only.
    return out_t[:, :batch].T                                      # (batch, A)


def _orthogonal(key, rows, cols, gain):
    """Deterministic orthogonal init matching torch.nn.init.orthogonal_ semantics."""
    flat = jax.random.normal(key, (max(rows, cols), min(rows, cols)), jnp.float32)
    q, r = jnp.linalg.qr(flat)
    d = jnp.diagonal(r)
    q = q * jnp.where(d == 0, 1.0, jnp.sign(d))   # sign fix (guard d == 0)
    if rows < cols:
        q = q.T
    return gain * q[:rows, :cols]


def init_actor_params(key, state_size, action_size, hidden_size=64):
    """Weights in torch (out, in) layout, matching layer_init(std) of the spec."""
    root_2 = 2.0 ** 0.5
    k1, k2, k3 = jax.random.split(key, 3)
    w1 = _orthogonal(k1, hidden_size, state_size, root_2)
    w2 = _orthogonal(k2, hidden_size, hidden_size, root_2)
    w3 = _orthogonal(k3, action_size, hidden_size, 0.01)
    b1 = jnp.zeros((hidden_size,), jnp.float32)
    b2 = jnp.zeros((hidden_size,), jnp.float32)
    b3 = jnp.zeros((action_size,), jnp.float32)
    return w1, b1, w2, b2, w3, b3


if __name__ == "__main__":
    state_size = 4      # CartPole observation dim
    action_size = 2     # CartPole action dim
    hidden_size = 64
    batch = 2

    key = jax.random.PRNGKey(0)
    kx, kp = jax.random.split(key)

    x = jax.random.normal(kx, (batch, state_size), dtype=jnp.float32)
    w1, b1, w2, b2, w3, b3 = init_actor_params(kp, state_size, action_size, hidden_size)

    sdt, adt = default_dtypes()
    packed = pack_actor_params(w1, b1, w2, b2, w3, b3, dtype=sdt)

    out = actor_forward(x, packed, state_size=state_size, action_size=action_size,
                        hidden_size=hidden_size, act_dtype=adt)
    out = jax.block_until_ready(out)

    # Plain-JAX reference emulating the kernel's storage / activation dtypes.
    f32 = jnp.float32

    def q(a):
        return a.astype(sdt).astype(f32)

    xc = q(x.reshape(batch, -1))
    h1 = jnp.tanh((xc @ q(w1).T + q(b1)).astype(adt)).astype(f32)
    h2 = jnp.tanh((q(h1) @ q(w2).T + q(b2)).astype(adt)).astype(f32)
    ref = q(h2) @ q(w3).T + q(b3)

    tol = 1e-5 if sdt == jnp.float32 else 2e-2
    assert out.shape == (batch, action_size)
    assert jnp.allclose(out, ref, atol=tol, rtol=tol), "mismatch vs reference"

    print("KERNEL_OK")
</pallas_src>

<mosaic_0001>
module attributes {stable_mosaic.version = 11 : i64} {
  func.func @_actor_kernel(%arg0: i32, %arg1: memref<4x128xf32, #tpu.memory_space<vmem>>, %arg2: memref<288x128xf32, #tpu.memory_space<vmem>>, %arg3: memref<2x128xf32, #tpu.memory_space<vmem>>) attributes {dimension_semantics = [#tpu.dimension_semantics<parallel>], iteration_bounds = array<i64: 1>, scalar_prefetch = 0 : i64, scratch_operands = 0 : i64, tpu.core_type = #tpu.core_type<tc>, window_params = [{transform_indices = @transform_0, window_bounds = array<i64: 4, 128>}, {pipeline_mode = #tpu.pipeline_mode<synchronous>, transform_indices = @transform_1, window_bounds = array<i64: 288, 128>}, {transform_indices = @transform_2, window_bounds = array<i64: 2, 128>}]} {
    %c0 = arith.constant 0 : index
    %c0_0 = arith.constant 0 : index
    %0 = vector.load %arg1[%c0, %c0_0] : memref<4x128xf32, #tpu.memory_space<vmem>>, vector<4x128xf32>
    %c0_1 = arith.constant 0 : index
    %c0_2 = arith.constant 0 : index
    %1 = vector.load %arg2[%c0_1, %c0_2] : memref<288x128xf32, #tpu.memory_space<vmem>>, vector<64x4xf32>
    %c64 = arith.constant 64 : index
    %c0_3 = arith.constant 0 : index
    %2 = vector.load %arg2[%c64, %c0_3] : memref<288x128xf32, #tpu.memory_space<vmem>>, vector<64x1xf32>
    %cst = arith.constant dense<0.000000e+00> : vector<64x128xf32>
    %3 = tpu.matmul %1, %0, %cst {dimension_numbers = #tpu.dot_dimension_numbers<[1], [0], [0], [1], [0, 0, 1, 1], [], []>} : vector<64x4xf32>, vector<4x128xf32>, vector<64x128xf32> -> vector<64x128xf32>
    %4 = vector.broadcast %2 : vector<64x1xf32> to vector<64x128xf32>
    %5 = arith.addf %3, %4 : vector<64x128xf32>
    %6 = math.tanh %5 : vector<64x128xf32>
    %c128 = arith.constant 128 : index
    %c0_4 = arith.constant 0 : index
    %7 = vector.load %arg2[%c128, %c0_4] : memref<288x128xf32, #tpu.memory_space<vmem>>, vector<64x64xf32>
    %c192 = arith.constant 192 : index
    %c0_5 = arith.constant 0 : index
    %8 = vector.load %arg2[%c192, %c0_5] : memref<288x128xf32, #tpu.memory_space<vmem>>, vector<64x1xf32>
    %cst_6 = arith.constant dense<0.000000e+00> : vector<64x128xf32>
    %9 = tpu.matmul %7, %6, %cst_6 {dimension_numbers = #tpu.dot_dimension_numbers<[1], [0], [0], [1], [0, 0, 1, 1], [], []>} : vector<64x64xf32>, vector<64x128xf32>, vector<64x128xf32> -> vector<64x128xf32>
    %10 = vector.broadcast %8 : vector<64x1xf32> to vector<64x128xf32>
    %11 = arith.addf %9, %10 : vector<64x128xf32>
    %12 = math.tanh %11 : vector<64x128xf32>
    %c256 = arith.constant 256 : index
    %c0_7 = arith.constant 0 : index
    %13 = vector.load %arg2[%c256, %c0_7] : memref<288x128xf32, #tpu.memory_space<vmem>>, vector<8x64xf32>
    %c272 = arith.constant 272 : index
    %c0_8 = arith.constant 0 : index
    %14 = vector.load %arg2[%c272, %c0_8] : memref<288x128xf32, #tpu.memory_space<vmem>>, vector<8x1xf32>
    %cst_9 = arith.constant dense<0.000000e+00> : vector<8x128xf32>
    %15 = tpu.matmul %13, %12, %cst_9 {dimension_numbers = #tpu.dot_dimension_numbers<[1], [0], [0], [1], [0, 0, 1, 1], [], []>} : vector<8x64xf32>, vector<64x128xf32>, vector<8x128xf32> -> vector<8x128xf32>
    %16 = vector.broadcast %14 : vector<8x1xf32> to vector<8x128xf32>
    %17 = arith.addf %15, %16 : vector<8x128xf32>
    %18 = vector.extract_strided_slice %17 {offsets = [0, 0], sizes = [2, 128], strides = [1, 1]} : vector<8x128xf32> to vector<2x128xf32>
    %c0_10 = arith.constant 0 : index
    %c0_11 = arith.constant 0 : index
    %19 = vector.load %arg3[%c0_10, %c0_11] : memref<2x128xf32, #tpu.memory_space<vmem>>, vector<2x128xf32>
    tpu.vector_store %arg3[%c0_10, %c0_11], %18 {strides = array<i32>} : memref<2x128xf32, #tpu.memory_space<vmem>>, vector<2x128xf32>,
    return
  }
  func.func @transform_0(%arg0: i32) -> (i32, i32) {
    %c0_i32 = arith.constant 0 : i32
    %c0_i32_0 = arith.constant 0 : i32
    return %c0_i32, %arg0 : i32, i32
  }
  func.func @transform_1(%arg0: i32) -> (i32, i32) {
    %c0_i32 = arith.constant 0 : i32
    %c0_i32_0 = arith.constant 0 : i32
    %c0_i32_1 = arith.constant 0 : i32
    return %c0_i32, %c0_i32_0 : i32, i32
  }
  func.func @transform_2(%arg0: i32) -> (i32, i32) {
    %c0_i32 = arith.constant 0 : i32
    %c0_i32_0 = arith.constant 0 : i32
    return %c0_i32, %arg0 : i32, i32
  }
}

</mosaic_0001>

<bundles_post_ra>
// kernel: actor_forward.1
= control target key start
LH: loop header
LB: loop body
LE: loop exit
PB: predicated region body
PF: predicated region fallthrough
CT: control target
= control target key end

     0   :  { %7 = vsyncpa [#allocation3], 0  ;;  %s710_s9 = smov [#allocation2]   ;;  %s767_s0 = inlined_call_operand.vmem [shape: f32[4,128], index: 0, kind: input, shape index: {}]   ;;  %s768_s1 = inlined_call_operand.hbm [shape: f32[288,128], index: 1, kind: input, shape index: {}]   ;;  %s769_s2 = inlined_call_operand.vmem [shape: f32[2,128], index: 2, kind: output, shape index: {}]  }
   0x1   :  { %s15_s10 = sshll.u32 %s710_s9, 4  ;;  %s686_s13 = scalar_lea.hbm %s768_s1, 4608  ;;  %s16_s10 = int_to_ptr.vmem [resolvable:$true] %s15_s10 }
   0x2   :  { %p687_p0 = scmp.ne.s32.totalorder %s768_s1, %s686_s13  ;;  %p690_p1 = scmp.lt.u32.totalorder %s686_s13, %s768_s1 }
   0x4   :  { %p692_p2 = pnand %p690_p1, %p687_p0 }
   0x6   :  { %695 = shalt.err (!%p692_p2)
}
   0x7   :  { %s696_s18 = scalar_lea.vmem %s16_s10, 4608  ;;  %p701_p4 = scmp.lt.s32.totalorder %s16_s10, %s16_s10 }
   0x8   :  { %p697_p3 = scmp.ne.s32.totalorder %s16_s10, %s696_s18  ;;  %p702_p5 = scmp.lt.s32.totalorder %s696_s18, %s696_s18 }
   0xa   :  { %p703_p6 = por %p702_p5, %p701_p4 }
   0xc   :  { %p704_p7 = pnand %p703_p6, %p697_p3 }
   0xe   :  { %707 = shalt.err (!%p704_p7)
}
   0xf   :  { %s711_s19 = smov 128   ;;  %s712_s20 = smov 8  }
  0x10   :  { %21 = dma.hbm_to_vmem [thread:$0]  %s768_s1, 4608, %s16_s10, [#allocation3], %s711_s19, %s711_s19, %s712_s20  }
  0x11   :  { %708 = dma.done.wait [#allocation3], 4608  }
  0x12   :  { %709 = vsyncadd [#allocation3], 4294962688  ;;  %v713_v0 = vmov 0   ;;  %vm107_vm0 = vcmask 1043456   ;;  %vm82_vm1 = vcmask 31744   ;;  %v26_v2 = vld [vmem:[#allocation2] sm:$0xff] }
  0x13   :  { %652 = vset.pattern.permute.xlu0 %v713_v0  ;;  %653 = vset.pattern.permute.xlu1 %v713_v0  ;;  %v25_v1 = vld [vmem:[%s767_s0] sm:$0xf]  ;;  %v27_v3 = vld [vmem:[#allocation2 + $0x8] sm:$0xff]  ;;  %v28_v4 = vld [vmem:[#allocation2 + $0x10] sm:$0xff]  ;;  %vm280_vm2 = vcmask 523264   ;;  %vm715_vm3 = vmmov 0  }
  0x14   :  { %556 = vmatprep.subr.msk.mxu0 %vm107_vm0, %v25_v1  ;;  %558 = vmatprep.mubr.msk.f32.mxu0 %vm82_vm1, %v26_v2  ;;  %v34_v5 = vld [vmem:[#allocation2 + $0x40] sm:$0xff]  ;;  %v36_v6 = vld [vmem:[#allocation2 + $0x50] sm:$0xff]  ;;  %v29_v7 = vld [vmem:[#allocation2 + $0x18] sm:$0xff] }
  0x15   :  { %557 = vmatpush3.msk.msra.mxu0 %vm107_vm0, %v25_v1  ;;  %44 = vperm.xlu0 %652, %v34_v5   ;;  %v30_v8 = vld [vmem:[#allocation2 + $0x20] sm:$0xff]  ;;  %v35_v9 = vld [vmem:[#allocation2 + $0x48] sm:$0xff]  ;;  %v37_v10 = vld [vmem:[#allocation2 + $0x58] sm:$0xff] }
  0x16   :  { %559 = vmatmul.mubr.msk.f32.vlgmr.msra.gmra.mrb[0].mxu0 %vm82_vm1, %v27_v3  ;;  %54 = vperm.xlu1 %653, %v36_v6   ;;  %v31_v11 = vld [vmem:[#allocation2 + $0x28] sm:$0xff]  ;;  %v32_v12 = vld [vmem:[#allocation2 + $0x30] sm:$0xff]  ;;  %v38_v13 = vld [vmem:[#allocation2 + $0x60] sm:$0xff] }
  0x17   :  { %561 = vmatprep.mubr.msk.f32.mxu0 %vm82_vm1, %v28_v4  ;;  %v39_v14 = vld [vmem:[#allocation2 + $0x68] sm:$0xff]  ;;  %v33_v15 = vld [vmem:[#allocation2 + $0x38] sm:$0xff]  ;;  %v40_v16 = vld [vmem:[#allocation2 + $0x70] sm:$0xff] }
  0x18   :  { %v41_v17 = vld [vmem:[#allocation2 + $0x78] sm:$0xff]  ;;  %v232_v18 = vld [vmem:[#allocation2 + $0xc0] sm:$0xff]  ;;  %v233_v19 = vld [vmem:[#allocation2 + $0xc8] sm:$0xff] }
  0x19   :  { %49 = vperm.xlu0 %652, %v35_v9   ;;  %v234_v20 = vld [vmem:[#allocation2 + $0xd0] sm:$0xff]  ;;  %v235_v21 = vld [vmem:[#allocation2 + $0xd8] sm:$0xff]  ;;  %v236_v22 = vld [vmem:[#allocation2 + $0xe0] sm:$0xff] }
  0x1a   :  { %562 = vmatmul.mubr.msk.f32.gmra.mrb[2].mxu0 %vm82_vm1, %v29_v7  ;;  %59 = vperm.xlu1 %653, %v37_v10   ;;  %v237_v23 = vld [vmem:[#allocation2 + $0xe8] sm:$0xff]  ;;  %v238_v24 = vld [vmem:[#allocation2 + $0xf0] sm:$0xff]  ;;  %v239_v25 = vld [vmem:[#allocation2 + $0xf8] sm:$0xff]  ;;  %v714_v7 = vmov 0.0|0.0  }
  0x1b   :  { %564 = vmatprep.mubr.msk.f32.mxu0 %vm82_vm1, %v30_v8  ;;  %v419_v26 = vld [vmem:[#allocation2 + $0x110] sm:$0xff]  ;;  %v224_v27 = vld [vmem:[#allocation2 + $0x80] sm:$0xff]  ;;  %v225_v0 = vld [vmem:[#allocation2 + $0x88] sm:$0xff]  ;;  %633 = vmatprep.subr.bf16.mxu0 %v714_v7  ;;  %v716_v8 = vmov 0.0  }
  0x1c   :  { %586 = vmatprep.mubr.msk.f32.mxu1 %vm280_vm2, %v224_v27  ;;  %v226_v1 = vld [vmem:[#allocation2 + $0x90] sm:$0xff]  ;;  %v227_v2 = vld [vmem:[#allocation2 + $0x98] sm:$0xff]  ;;  %v228_v3 = vld [vmem:[#allocation2 + $0xa0] sm:$0xff] }
  0x1d   :  { %64 = vperm.xlu0 %652, %v38_v13   ;;  %v229_v4 = vld [vmem:[#allocation2 + $0xa8] sm:$0xff]  ;;  %v230_v5 = vld [vmem:[#allocation2 + $0xb0] sm:$0xff]  ;;  %v231_v6 = vld [vmem:[#allocation2 + $0xb8] sm:$0xff] }
  0x1e   :  { %565 = vmatmul.mubr.msk.f32.gmra.mrb[4].mxu0 %vm82_vm1, %v31_v11  ;;  %69 = vperm.xlu1 %653, %v39_v14  }
  0x1f   :  { %567 = vmatprep.mubr.msk.f32.mxu0 %vm82_vm1, %v32_v12 }
  0x21   :  { %74 = vperm.xlu0 %652, %v40_v16  }
  0x22   :  { %568 = vmatmul.mubr.msk.f32.gmra.mrb[6].mxu0 %vm82_vm1, %v33_v15  ;;  %79 = vperm.xlu1 %653, %v41_v17  }
  0x23   :  { %614 = vmatprep.mubr.msk.f32.mxu0 %vm715_vm3, %v716_v8 }
  0x25   :  { %242 = vperm.xlu0 %652, %v232_v18  }
  0x26   :  { %247 = vperm.xlu1 %653, %v233_v19  }
  0x29   :  { %252 = vperm.xlu0 %652, %v234_v20  }
  0x2a   :  { %257 = vperm.xlu1 %653, %v235_v21  }
  0x2d   :  { %262 = vperm.xlu0 %652, %v236_v22  }
  0x2e   :  { %267 = vperm.xlu1 %653, %v237_v23  }
  0x31   :  { %272 = vperm.xlu0 %652, %v238_v24  }
  0x32   :  { %277 = vperm.xlu1 %653, %v239_v25  }
  0x35   :  { %422 = vperm.xlu0 %652, %v419_v26  }
  0x94   :  { %v45_v28 = vpop.permute.xlu0 %44 }
  0x95   :  { %v55_v29 = vpop.permute.xlu1 %54 }
  0x98   :  { %v50_v30 = vpop.permute.xlu0 %49 }
  0x99   :  { %v60_v31 = vpop.permute.xlu1 %59 }
  0x9c   :  { %v65_v41 = vpop.permute.xlu0 %64 }
  0x9d   :  { %v70_v39 = vpop.permute.xlu1 %69 }
  0xa0   :  { %v75_v49 = vpop.permute.xlu0 %74 }
  0xa1   :  { %v80_v46 = vpop.permute.xlu1 %79 }
  0xa4   :  { %v243_v10 = vpop.permute.xlu0 %242 }
  0xa5   :  { %v248_v9 = vpop.permute.xlu1 %247 }
  0xa8   :  { %v253_v13 = vpop.permute.xlu0 %252 }
  0xa9   :  { %v258_v11 = vpop.permute.xlu1 %257 }
  0xac   :  { %v263_v22 = vpop.permute.xlu0 %262 }
  0xad   :  { %v268_v20 = vpop.permute.xlu1 %267 }
  0xb1   :  { %v278_v27 = vpop.permute.xlu1 %277 }
  0xe9   :  { %v560_v32 = vpop.f32.mrb[0].mxu0 }
  0xea   :  { %v183_v33 = vadd.f32 %v560_v32, %v50_v30  ;;  %v177_v34 = vpop.f32.mrb[1].mxu0  ;;  %v273_v30 = vpop.permute.xlu0 %272 }
  0xeb   :  { %v178_v35 = vadd.f32 %v177_v34, %v45_v28 }
  0xec   :  { %654 = vtanh.f32 %v183_v33 }
  0xed   :  { %656 = vtanh.f32 %v178_v35  ;;  %v563_v36 = vpop.f32.mrb[2].mxu0 }
  0xee   :  { %v193_v37 = vadd.f32 %v563_v36, %v60_v31  ;;  %v187_v38 = vpop.f32.mrb[3].mxu0 }
  0xef   :  { %v188_v40 = vadd.f32 %v187_v38, %v55_v29 }
  0xf0   :  { %658 = vtanh.f32 %v193_v37 }
  0xf1   :  { %660 = vtanh.f32 %v188_v40  ;;  %v566_v42 = vpop.f32.mrb[4].mxu0 }
  0xf2   :  { %v203_v43 = vadd.f32 %v566_v42, %v70_v39  ;;  %v197_v44 = vpop.f32.mrb[5].mxu0 }
  0xf3   :  { %v198_v45 = vadd.f32 %v197_v44, %v65_v41 }
  0xf4   :  { %662 = vtanh.f32 %v203_v43 }
  0xf5   :  { %664 = vtanh.f32 %v198_v45  ;;  %v569_v47 = vpop.f32.mrb[6].mxu0  ;;  %v418_v45 = vld [vmem:[#allocation2 + $0x100] sm:$0xff] }
  0xf6   :  { %v655_v48 = vpop.eup %654  ;;  %v213_v50 = vadd.f32 %v569_v47, %v80_v46  ;;  %v207_v51 = vpop.f32.mrb[7].mxu0 }
  0xf7   :  { %v657_v52 = vpop.eup %656  ;;  %v208_v53 = vadd.f32 %v207_v51, %v75_v49  ;;  %v423_v46 = vpop.permute.xlu0 %422 }
  0xf8   :  { %666 = vtanh.f32 %v213_v50  ;;  %v617_v54 = vpack.c.bf16 %v655_v48, %v657_v52 }
  0xf9   :  { %668 = vtanh.f32 %v208_v53 }
  0xfa   :  { %v659_v55 = vpop.eup %658  ;;  %618 = vmatprep.subr.bf16.mxu1 %v617_v54 }
  0xfb   :  { %v661_v56 = vpop.eup %660  ;;  %620 = vmatpush3.bf16.msra.mxu1 %v617_v54 }
  0xfc   :  { %v621_v57 = vpack.c.bf16 %v659_v55, %v661_v56 }
  0xfe   :  { %v663_v58 = vpop.eup %662  ;;  %622 = vmatprep.subr.bf16.mxu1 %v621_v57 }
  0xff   :  { %v665_v59 = vpop.eup %664  ;;  %624 = vmatpush3.bf16.msra.mxu1 %v621_v57 }
 0x100   :  { %v625_v60 = vpack.c.bf16 %v663_v58, %v665_v59 }
 0x102   :  { %v667_v61 = vpop.eup %666  ;;  %626 = vmatprep.subr.bf16.mxu1 %v625_v60 }
 0x103   :  { %v669_v62 = vpop.eup %668  ;;  %628 = vmatpush3.bf16.msra.mxu1 %v625_v60 }
 0x104   :  { %v629_v63 = vpack.c.bf16 %v667_v61, %v669_v62 }
 0x106   :  { %630 = vmatprep.subr.bf16.mxu1 %v629_v63 }
 0x107   :  { %632 = vmatpush3.bf16.msra.mxu1 %v629_v63 }
 0x10a   :  { %587 = vmatmul.mubr.msk.f32.vlgmr.msra.gmra.mrb[0].mxu1 %vm280_vm2, %v225_v0 }
 0x10b   :  { %589 = vmatprep.mubr.msk.f32.mxu1 %vm280_vm2, %v226_v1 }
 0x10e   :  { %590 = vmatmul.mubr.msk.f32.gmra.mrb[2].mxu1 %vm280_vm2, %v227_v2 }
 0x10f   :  { %592 = vmatprep.mubr.msk.f32.mxu1 %vm280_vm2, %v228_v3 }
 0x112   :  { %593 = vmatmul.mubr.msk.f32.gmra.mrb[4].mxu1 %vm280_vm2, %v229_v4 }
 0x113   :  { %595 = vmatprep.mubr.msk.f32.mxu1 %vm280_vm2, %v230_v5 }
 0x116   :  { %596 = vmatmul.mubr.msk.f32.gmra.mrb[6].mxu1 %vm280_vm2, %v231_v6 }
 0x1dd   :  { %v588_v12 = vpop.f32.mrb[0].mxu1 }
 0x1de   :  { %v377_v14 = vadd.f32 %v588_v12, %v248_v9  ;;  %v371_v15 = vpop.f32.mrb[1].mxu1 }
 0x1df   :  { %v372_v16 = vadd.f32 %v371_v15, %v243_v10 }
 0x1e0   :  { %670 = vtanh.f32 %v377_v14 }
 0x1e1   :  { %672 = vtanh.f32 %v372_v16  ;;  %v591_v17 = vpop.f32.mrb[2].mxu1 }
 0x1e2   :  { %v387_v18 = vadd.f32 %v591_v17, %v258_v11  ;;  %v381_v19 = vpop.f32.mrb[3].mxu1 }
 0x1e3   :  { %v382_v21 = vadd.f32 %v381_v19, %v253_v13 }
 0x1e4   :  { %674 = vtanh.f32 %v387_v18 }
 0x1e5   :  { %676 = vtanh.f32 %v382_v21  ;;  %v594_v23 = vpop.f32.mrb[4].mxu1 }
 0x1e6   :  { %v397_v24 = vadd.f32 %v594_v23, %v268_v20  ;;  %v391_v25 = vpop.f32.mrb[5].mxu1 }
 0x1e7   :  { %v392_v26 = vadd.f32 %v391_v25, %v263_v22 }
 0x1e8   :  { %678 = vtanh.f32 %v397_v24 }
 0x1e9   :  { %680 = vtanh.f32 %v392_v26  ;;  %v597_v28 = vpop.f32.mrb[6].mxu1 }
 0x1ea   :  { %v671_v29 = vpop.eup %670  ;;  %v407_v31 = vadd.f32 %v597_v28, %v278_v27  ;;  %v401_v32 = vpop.f32.mrb[7].mxu1 }
 0x1eb   :  { %v673_v33 = vpop.eup %672  ;;  %v402_v34 = vadd.f32 %v401_v32, %v273_v30 }
 0x1ec   :  { %682 = vtanh.f32 %v407_v31  ;;  %v634_v35 = vpack.c.bf16 %v671_v29, %v673_v33 }
 0x1ed   :  { %684 = vtanh.f32 %v402_v34 }
 0x1ee   :  { %v675_v36 = vpop.eup %674  ;;  %635 = vmatpush3.bf16.msra.mxu0 %v634_v35 }
 0x1ef   :  { %v677_v37 = vpop.eup %676  ;;  %636 = vmatprep.subr.bf16.mxu0 %v714_v7 }
 0x1f0   :  { %v637_v38 = vpack.c.bf16 %v675_v36, %v677_v37 }
 0x1f2   :  { %v679_v39 = vpop.eup %678  ;;  %638 = vmatpush3.bf16.msra.mxu0 %v637_v38 }
 0x1f3   :  { %v681_v40 = vpop.eup %680  ;;  %639 = vmatprep.subr.bf16.mxu0 %v714_v7 }
 0x1f4   :  { %v640_v41 = vpack.c.bf16 %v679_v39, %v681_v40 }
 0x1f6   :  { %v683_v42 = vpop.eup %682  ;;  %641 = vmatpush3.bf16.msra.mxu0 %v640_v41 }
 0x1f7   :  { %v685_v43 = vpop.eup %684  ;;  %642 = vmatprep.subr.bf16.mxu0 %v714_v7 }
 0x1f8   :  { %v643_v44 = vpack.c.bf16 %v683_v42, %v685_v43 }
 0x1fa   :  { %644 = vmatpush3.bf16.msra.mxu0 %v643_v44 }
 0x1fd   :  { %615 = vmatmul.mubr.msk.f32.vlgmr.msra.gmra.mrb[8].mxu0 %vm280_vm2, %v418_v45 }
 0x2d0   :  { %v494_v47 = vpop.f32.mrb[8].mxu0 }
 0x2d1   :  { %v495_v48 = vadd.f32 %v494_v47, %v423_v46  ;;  %v616_v49 = vpop.f32.mrb[9].mxu0 }
 0x2d3   :  { %498 = vst [vmem:[%s769_s2] sm:$0x3] %v495_v48 }
 0x2d4   :  { %503 = vsyncpa [#allocation3], 1 }

</bundles_post_ra>
